<compile_context>
chip_gen: v5e
topology: v5e:2x2
jax: 0.10.0
libtpu: 0.0.40
codegen_flags: <defaults>
</compile_context>

<pallas_src>
import jax
import jax.numpy as jnp
from jax.experimental import pallas as pl
from jax.experimental.pallas import tpu as pltpu


def _round_up(n, m):
    return ((n + m - 1) // m) * m


def _cdiv(a, b):
    return (a + b - 1) // b


def residual_block_kernel(x_ref, w_ref, b_ref, o_ref):
    # x_ref: (TB, F_pad) f32 input rows (full feature width, resident across the
    #        output-feature grid axis).
    # w_ref: (F_pad, TN) weight panel, pre-transposed to (in, out) layout in the
    #        wrapper -> canonical (M,K)x(K,N) MXU contraction, no in-kernel transpose.
    # b_ref: (1, TN) f32 bias panel.
    # o_ref: (TB, TN) output panel.
    tile_n = o_ref.shape[-1]
    x = x_ref[...]
    h = jnp.tanh(x).astype(w_ref.dtype)                     # Layer1 tanh (f32), cast to MXU dtype
    z = jnp.dot(h, w_ref[...], preferred_element_type=jnp.float32)
    z = z + b_ref[...]                                      # bias broadcast over rows (f32)
    if tile_n == x_ref.shape[-1]:
        x_res = x
    else:
        # Residual only needs this output tile's columns of x (128-aligned slice of
        # the already-resident x tile; no extra DMA).
        n_start = pl.multiple_of(pl.program_id(1) * tile_n, 128)
        x_res = x_ref[:, pl.ds(n_start, tile_n)]
    o_ref[...] = (x_res + jnp.tanh(z)).astype(o_ref.dtype)  # Layer2 tanh + residual


def _vmem_bytes(tile_b, f_pad, tile_n, x_item, w_item, w_bufs):
    """Estimated VMEM working set (pipeline buffers + in-kernel temporaries)."""
    return (2 * tile_b * f_pad * x_item           # x tile, double-buffered
            + 2 * tile_b * tile_n * x_item        # out tile, double-buffered
            + w_bufs * f_pad * tile_n * w_item    # weight panel
            + 2 * 8 * tile_n * 4                  # bias (sublane-padded)
            + tile_b * f_pad * (x_item + w_item)  # x value + tanh(x) temporaries
            + 2 * tile_b * tile_n * 4             # f32 matmul result + residual temp
            + (2 << 20))                          # headroom


def residual_block(x, w, b, *, tile_b=512, matmul_dtype=jnp.bfloat16, _force_tile_n=None):
    """y = x + tanh(tanh(x) @ W.T + b).

    x: (B, F) f32, w: (F, F) PyTorch nn.Linear weight (out_features x in_features),
    b: (F,). Returns (B, F).

    matmul_dtype: MXU operand dtype for tanh(x) and W (accumulation is always f32).
    bf16 is the default (native MXU dtype on v5e/v6e/v7x; halves weight DMA/VMEM);
    pass jnp.float32 for a full-precision matmul.
    _force_tile_n: test hook to force the output-feature tiling path.
    """
    B, F = x.shape
    assert w.shape == (F, F) and b.shape == (F,)
    out_dtype = x.dtype
    x_item = jnp.dtype(x.dtype).itemsize
    mm_dtype = jnp.dtype(matmul_dtype) if matmul_dtype is not None else jnp.dtype(w.dtype)
    w_item = mm_dtype.itemsize

    F_pad = _round_up(F, 128)   # lane-dense feature dim

    # Per-generation VMEM cap (~85% of physical per-TensorCore VMEM).  Conservative
    # 64 MiB (v7x per-TC) fallback if the query is unavailable.
    try:
        vmem_cap = int(pltpu.get_tpu_info().vmem_capacity_bytes)
    except Exception:
        vmem_cap = 64 << 20
    vmem_budget = int(vmem_cap * 0.85)

    # --- Batch tiling: minimal padding, and >=2 grid steps for larger batches so
    # v7x's two TensorCores both get work and the pipeline has something to overlap.
    tile_cap = max(8, _round_up(min(tile_b, max(B, 1)), 8))
    steps = _cdiv(B, tile_cap)
    if B >= 512:
        steps = max(steps, 4)
    elif B >= 128:
        steps = max(steps, 2)
    tile_b_eff = _round_up(_cdiv(B, steps), 8)
    # Shrink the batch tile if even the narrowest (128-wide) weight panel would not fit.
    while tile_b_eff > 8 and _vmem_bytes(tile_b_eff, F_pad, min(128, F_pad),
                                         x_item, w_item, 2) > vmem_budget:
        tile_b_eff = max(8, _round_up(tile_b_eff // 2, 8))
    steps = _cdiv(B, tile_b_eff)
    B_pad = steps * tile_b_eff   # at most ~8*steps rows of padding

    # --- Output-feature (N) tiling: keep the full (F_pad, F_pad) weight resident when
    # it fits the budget, otherwise tile N.  K stays whole -> no accumulator needed.
    tile_n = None
    for cand in range(F_pad, 0, -128):
        if F_pad % cand != 0:
            continue
        bufs = 1 if cand == F_pad else 2          # invariant weight -> single buffer
        if _vmem_bytes(tile_b_eff, F_pad, cand, x_item, w_item, bufs) <= vmem_budget:
            tile_n = cand
            break
    if tile_n is None:
        tile_n = min(128, F_pad)
    if _force_tile_n is not None:
        assert F_pad % _force_tile_n == 0 and _force_tile_n % 128 == 0
        tile_n = _force_tile_n
    num_n = F_pad // tile_n
    w_bufs = 1 if num_n == 1 else 2
    # TODO(synk): if F ever grows so large that even a (F_pad, 128) weight panel does
    # not fit VMEM, add a K grid axis with an f32 accumulator ("arbitrary" semantics).

    needed = _vmem_bytes(tile_b_eff, F_pad, tile_n, x_item, w_item, w_bufs)
    # Always pass a limit (v5e's default is only 16 MiB); never exceed the per-gen cap.
    vmem_limit = int(min(max(needed, 32 << 20), vmem_budget))

    # --- Padding (exact math: padded x columns, padded W rows/cols and padded b
    # entries are zero, so padded output columns are exactly zero and padded rows are
    # sliced away).  No copies at all when B and F are already aligned.
    x_p = x
    if (B_pad, F_pad) != (B, F):
        x_p = jnp.zeros((B_pad, F_pad), x.dtype).at[:B, :F].set(x)
    w_p, b_p = w, b
    if F_pad != F:
        w_p = jnp.zeros((F_pad, F_pad), w.dtype).at[:F, :F].set(w)
        b_p = jnp.zeros((F_pad,), b.dtype).at[:F].set(b)
    # Pre-transpose ONCE in the wrapper to (in_features, out_features) and cast once
    # to the MXU dtype (amortized over all batch tiles; halves weight DMA for bf16).
    w_t = w_p.T
    if w_t.dtype != mm_dtype:
        w_t = w_t.astype(mm_dtype)
    b_p = b_p.reshape(1, F_pad).astype(jnp.float32)

    w_spec_kwargs = {}
    if num_n == 1:
        # Grid-invariant weight block: a second pipeline buffer is pure VMEM waste.
        w_spec_kwargs["pipeline_mode"] = pl.Buffered(1)

    out = pl.pallas_call(
        residual_block_kernel,
        out_shape=jax.ShapeDtypeStruct((B_pad, F_pad), out_dtype),
        grid_spec=pltpu.PrefetchScalarGridSpec(
            num_scalar_prefetch=0,
            grid=(B_pad // tile_b_eff, num_n),
            in_specs=[
                pl.BlockSpec((tile_b_eff, F_pad), lambda i, j: (i, 0)),  # x rows, resident across j
                pl.BlockSpec((F_pad, tile_n), lambda i, j: (0, j), **w_spec_kwargs),
                pl.BlockSpec((1, tile_n), lambda i, j: (0, j)),          # bias panel
            ],
            out_specs=pl.BlockSpec((tile_b_eff, tile_n), lambda i, j: (i, j)),
        ),
        compiler_params=pltpu.CompilerParams(
            dimension_semantics=("parallel", "parallel"),  # no reduction axis
            vmem_limit_bytes=vmem_limit),
    )(x_p, w_t, b_p)

    if (B_pad, F_pad) != (B, F):
        out = out[:B, :F]
    return out


def reference(x, w, b):
    h = jnp.tanh(x)
    z = h @ w.T + b
    return x + jnp.tanh(z)


if __name__ == "__main__":
    key = jax.random.PRNGKey(0)
    kx, kw, kb = jax.random.split(key, 3)

    # Small shape consistent with the module (hidden=32).
    B, F = 8, 32
    x = jax.random.normal(kx, (B, F), dtype=jnp.float32)
    bound = 1.0 / jnp.sqrt(jnp.float32(F))
    w = jax.random.uniform(kw, (F, F), dtype=jnp.float32, minval=-bound, maxval=bound)
    b = jax.random.uniform(kb, (F,), dtype=jnp.float32, minval=-bound, maxval=bound)
    ref = reference(x, w, b)

    out = jax.block_until_ready(residual_block(x, w, b))        # default bf16 MXU path
    assert out.shape == (B, F)
    assert jnp.allclose(out, ref, atol=3e-2, rtol=3e-2), "mismatch (bf16 MXU, small)"

    out_f32 = jax.block_until_ready(residual_block(x, w, b, matmul_dtype=jnp.float32))
    assert jnp.allclose(out_f32, ref, atol=1e-5, rtol=1e-5), "mismatch (f32 MXU, small)"

    # Ragged batch + non-128 feature dim: exercises padding and the 2-step batch grid.
    B2, F2 = 300, 200
    x2 = jax.random.normal(kx, (B2, F2), dtype=jnp.float32)
    bound2 = 1.0 / jnp.sqrt(jnp.float32(F2))
    w2 = jax.random.uniform(kw, (F2, F2), dtype=jnp.float32, minval=-bound2, maxval=bound2)
    b2 = jax.random.uniform(kb, (F2,), dtype=jnp.float32, minval=-bound2, maxval=bound2)
    ref2 = reference(x2, w2, b2)

    out2 = jax.block_until_ready(residual_block(x2, w2, b2, matmul_dtype=jnp.float32))
    assert out2.shape == (B2, F2)
    assert jnp.allclose(out2, ref2, atol=1e-5, rtol=1e-5), "mismatch (f32 MXU, padded)"

    out2_bf16 = jax.block_until_ready(residual_block(x2, w2, b2))
    assert jnp.allclose(out2_bf16, ref2, atol=3e-2, rtol=3e-2), "mismatch (bf16 MXU, padded)"

    # Force the output-feature (N) tiling path (weight blocked along N, x resident).
    out2_nt = jax.block_until_ready(
        residual_block(x2, w2, b2, matmul_dtype=jnp.float32, _force_tile_n=128))
    assert jnp.allclose(out2_nt, ref2, atol=1e-5, rtol=1e-5), "mismatch (N-tiled path)"

    # Fully aligned case: no wrapper pad / slice copies at all.
    B3, F3 = 256, 128
    x3 = jax.random.normal(kx, (B3, F3), dtype=jnp.float32)
    w3 = jax.random.uniform(kw, (F3, F3), dtype=jnp.float32, minval=-0.1, maxval=0.1)
    b3 = jax.random.uniform(kb, (F3,), dtype=jnp.float32, minval=-0.1, maxval=0.1)
    out3 = jax.block_until_ready(residual_block(x3, w3, b3, matmul_dtype=jnp.float32))
    assert jnp.allclose(out3, reference(x3, w3, b3), atol=1e-5, rtol=1e-5), "mismatch (aligned)"

    print("KERNEL_OK")
</pallas_src>

<mosaic_0001>
module attributes {stable_mosaic.version = 11 : i64} {
  func.func @residual_block_kernel(%arg0: i32, %arg1: i32, %arg2: memref<8x128xf32, #tpu.memory_space<vmem>>, %arg3: memref<128x128xbf16, #tpu.memory_space<vmem>>, %arg4: memref<1x128xf32, #tpu.memory_space<vmem>>, %arg5: memref<8x128xf32, #tpu.memory_space<vmem>>) attributes {dimension_semantics = [#tpu.dimension_semantics<parallel>, #tpu.dimension_semantics<parallel>], iteration_bounds = array<i64: 1, 1>, scalar_prefetch = 0 : i64, scratch_operands = 0 : i64, tpu.core_type = #tpu.core_type<tc>, window_params = [{transform_indices = @transform_0, window_bounds = array<i64: 8, 128>}, {pipeline_mode = #tpu.pipeline_mode<synchronous>, transform_indices = @transform_1, window_bounds = array<i64: 128, 128>}, {transform_indices = @transform_2, window_bounds = array<i64: 1, 128>}, {transform_indices = @transform_3, window_bounds = array<i64: 8, 128>}]} {
    %c0 = arith.constant 0 : index
    %c0_0 = arith.constant 0 : index
    %0 = vector.load %arg2[%c0, %c0_0] : memref<8x128xf32, #tpu.memory_space<vmem>>, vector<8x128xf32>
    %1 = math.tanh %0 : vector<8x128xf32>
    %2 = arith.truncf %1 : vector<8x128xf32> to vector<8x128xbf16>
    %c0_1 = arith.constant 0 : index
    %c0_2 = arith.constant 0 : index
    %3 = vector.load %arg3[%c0_1, %c0_2] : memref<128x128xbf16, #tpu.memory_space<vmem>>, vector<128x128xbf16>
    %cst = arith.constant dense<0.000000e+00> : vector<8x128xf32>
    %4 = tpu.matmul %2, %3, %cst {dimension_numbers = #tpu.dot_dimension_numbers<[1], [0], [0], [1], [0, 0, 1, 1], [], []>} : vector<8x128xbf16>, vector<128x128xbf16>, vector<8x128xf32> -> vector<8x128xf32>
    %c0_3 = arith.constant 0 : index
    %c0_4 = arith.constant 0 : index
    %5 = vector.load %arg4[%c0_3, %c0_4] : memref<1x128xf32, #tpu.memory_space<vmem>>, vector<1x128xf32>
    %6 = vector.broadcast %5 : vector<1x128xf32> to vector<8x128xf32>
    %7 = arith.addf %4, %6 : vector<8x128xf32>
    %8 = math.tanh %7 : vector<8x128xf32>
    %9 = arith.addf %0, %8 : vector<8x128xf32>
    %c0_5 = arith.constant 0 : index
    %c0_6 = arith.constant 0 : index
    %10 = vector.load %arg5[%c0_5, %c0_6] : memref<8x128xf32, #tpu.memory_space<vmem>>, vector<8x128xf32>
    tpu.vector_store %arg5[%c0_5, %c0_6], %9 {strides = array<i32>} : memref<8x128xf32, #tpu.memory_space<vmem>>, vector<8x128xf32>,
    return
  }
  func.func @transform_0(%arg0: i32, %arg1: i32) -> (i32, i32) {
    %c0_i32 = arith.constant 0 : i32
    %c0_i32_0 = arith.constant 0 : i32
    return %arg0, %c0_i32 : i32, i32
  }
  func.func @transform_1(%arg0: i32, %arg1: i32) -> (i32, i32) {
    %c0_i32 = arith.constant 0 : i32
    %c0_i32_0 = arith.constant 0 : i32
    return %c0_i32, %arg1 : i32, i32
  }
  func.func @transform_2(%arg0: i32, %arg1: i32) -> (i32, i32) {
    %c0_i32 = arith.constant 0 : i32
    %c0_i32_0 = arith.constant 0 : i32
    return %c0_i32, %arg1 : i32, i32
  }
  func.func @transform_3(%arg0: i32, %arg1: i32) -> (i32, i32) {
    %c0_i32 = arith.constant 0 : i32
    return %arg0, %arg1 : i32, i32
  }
}

</mosaic_0001>

<bundles_post_ra>
// kernel: tpu_custom_call.1
= control target key start
LH: loop header
LB: loop body
LE: loop exit
PB: predicated region body
PF: predicated region fallthrough
CT: control target
= control target key end

     0   :  { %8 = vsyncpa [#allocation3], 0  ;;  %s315_s0 = inlined_call_operand.hbm [shape: f32[8,128], index: 0, kind: input, shape index: {}]   ;;  %s316_s1 = inlined_call_operand.hbm [shape: bf16[128,128], index: 1, kind: input, shape index: {}]   ;;  %s317_s2 = inlined_call_operand.vmem [shape: f32[1,128], index: 2, kind: input, shape index: {}]   ;;  %s318_s3 = inlined_call_operand.hbm [shape: f32[8,128], index: 3, kind: output, shape index: {}]  }
   0x1   :  { %9 = vsyncpa [#allocation6], 0 }
   0x2   :  { %10 = vsyncpa [#allocation4], 0  ;;  %s16_s14 = sshll.u32 %s315_s0, 4  ;;  %s278_s15 = smov [#allocation2]   ;;  %s17_s14 = int_to_ptr.hbm [resolvable:$true] %s16_s14 }
   0x3   :  { %s18_s16 = sshll.u32 %s278_s15, 4  ;;  %s26_s19 = sshll.u32 %s316_s1, 4  ;;  %s19_s16 = int_to_ptr.vmem [resolvable:$true] %s18_s16  ;;  %s27_s19 = int_to_ptr.hbm [resolvable:$true] %s26_s19 }
   0x4   :  { %21 = dma.hbm_to_vmem [thread:$0]  %s17_s14, 128, %s19_s16, [#allocation3]  }
   0x5   :  { %s279_s20 = smov [#allocation5]   ;;  %s280_s22 = smov 64  }
   0x6   :  { %s28_s21 = sshll.u32 %s279_s20, 4  ;;  %s281_s23 = smov 4   ;;  %s29_s21 = int_to_ptr.vmem [resolvable:$true] %s28_s21 }
   0x7   :  { %34 = dma.hbm_to_vmem [thread:$0]  %s27_s19, 1024, %s29_s21, [#allocation6], %s280_s22, %s280_s22, %s281_s23  }
   0x8   :  { %272 = dma.done.wait [#allocation3], 128  }
   0x9   :  { %273 = vsyncadd [#allocation3], 4294967168 }
   0xa   :  { %274 = dma.done.wait [#allocation6], 1024  }
   0xb   :  { %275 = vsyncadd [#allocation6], 4294966272  ;;  %v189_v0 = vld [vmem:[#allocation5 + $0x38] sm:$0xff]  ;;  %v188_v1 = vld [vmem:[#allocation5 + $0x30] sm:$0xff]  ;;  %s282_s24 = smov [#allocation7]   ;;  %s139_s28 = sshll.u32 %s318_s3, 4  ;;  %s140_s28 = int_to_ptr.hbm [resolvable:$true] %s139_s28 }
   0xc   :  { %116 = vmatpush.bf16.msra.mxu0 %v189_v0  ;;  %v187_v2 = vld [vmem:[#allocation5 + $0x28] sm:$0xff]  ;;  %v186_v3 = vld [vmem:[#allocation5 + $0x20] sm:$0xff]  ;;  %v185_v4 = vld [vmem:[#allocation5 + $0x18] sm:$0xff]  ;;  %s137_s25 = sshll.u32 %s282_s24, 4  ;;  %s138_s25 = int_to_ptr.vmem [resolvable:$true] %s137_s25 }
   0xd   :  { %v45_v5 = vld [vmem:[#allocation2] sm:$0xff]  ;;  %v184_v6 = vld [vmem:[#allocation5 + $0x10] sm:$0xff]  ;;  %v183_v7 = vld [vmem:[#allocation5 + $0x8] sm:$0xff] }
   0xe   :  { %196 = vtanh.f32 %v45_v5  ;;  %v182_v9 = vld [vmem:[#allocation5] sm:$0xff]  ;;  %v195_v11 = vld [vmem:[%s317_s2] ss:$0 sm:$0xff] }
  0x10   :  { %117 = vmatpush.bf16.msra.mxu0 %v188_v1 }
  0x14   :  { %118 = vmatpush.bf16.msra.mxu0 %v187_v2  ;;  %v197_v8 = vpop.eup %196 }
  0x15   :  { %v47_v10 = vpack.c.bf16 %v197_v8, %v197_v8 }
  0x18   :  { %119 = vmatpush.bf16.msra.mxu0 %v186_v3 }
  0x1c   :  { %120 = vmatpush.bf16.msra.mxu0 %v185_v4 }
  0x20   :  { %121 = vmatpush.bf16.msra.mxu0 %v184_v6 }
  0x24   :  { %122 = vmatpush.bf16.msra.mxu0 %v183_v7 }
  0x28   :  { %123 = vmatpush.bf16.msra.mxu0 %v182_v9 }
  0x2b   :  { %124 = vmatmul.bf16.vlgmr.msra.gmra.mxu0 %v47_v10 }
  0xa8   :  { %v125_v12 = vpop.f32.mrf.mxu0 }
  0xa9   :  { %v126_v13 = vadd.f32 %v195_v11, %v125_v12 }
  0xab   :  { %198 = vtanh.f32 %v126_v13 }
  0xb0   :  { %v127_v14 = vpop.f32.mrf.mxu0 }
  0xb1   :  { %v199_v15 = vpop.eup %198 }
  0xb2   :  { %v130_v16 = vadd.f32 %v199_v15, %v45_v5 }
  0xb4   :  { %131 = vst [vmem:[#allocation7] sm:$0xff] %v130_v16 }
  0xb5   :  { %142 = dma.vmem_to_hbm [thread:$0]  %s138_s25, 128, %s140_s28, [#allocation4]  }
  0xb6   :  { %276 = dma.done.wait [#allocation4], 128  }
  0xb7   :  { %277 = vsyncadd [#allocation4], 4294967168 }
  0xb8   :  { %147 = vsyncpa [#allocation3], 1 }
  0xb9   :  { %148 = vsyncpa [#allocation6], 1 }
  0xba   :  { %149 = vsyncpa [#allocation4], 1 }

</bundles_post_ra>
